<compile_context>
chip_gen: v5e
topology: v5e:2x2
jax: 0.10.0
libtpu: 0.0.40
codegen_flags: <defaults>
</compile_context>

<pallas_src>
import functools

import jax
import jax.numpy as jnp
from jax.experimental import pallas as pl
from jax.experimental.pallas import tpu as pltpu


# ---------------------------------------------------------------------------
# Tiling helpers
# ---------------------------------------------------------------------------

def _round_up(a, b):
    return (a + b - 1) // b * b


def _cdiv(a, b):
    return (a + b - 1) // b


def _vmem_capacity_bytes():
    try:
        return int(pltpu.get_tpu_info().vmem_capacity_bytes)
    except Exception:
        # Unknown generation / query unsupported: assume the tightest budget
        # (v7x: 64 MiB per TensorCore) so tiles are always safe.
        return 64 * 1024 * 1024


def _tile_caps(in_itemsize):
    """Generation-aware tile caps (sized to per-TensorCore VMEM)."""
    vmem_cap = _vmem_capacity_bytes()
    big_vmem = vmem_cap >= 96 * 1024 * 1024      # v5e / v6e (128 MiB)
    tm_cap = 512
    tn_cap = 1024
    tk_cap = 2048 if big_vmem else 1024          # v7x (64 MiB/TC): smaller K tile
    if in_itemsize <= 2:                         # bf16 halves DMA bytes -> deeper K
        tk_cap *= 2
    return tm_cap, tn_cap, tk_cap, vmem_cap


def _choose_tile(dim, cap, align):
    """Full-extent block if it fits the cap (no padding, always layout-legal);
    otherwise a balanced, `align`-multiple tile <= cap."""
    if dim <= cap:
        return dim
    nt = _cdiv(dim, cap)
    return min(cap, _round_up(_cdiv(dim, nt), align))


# ---------------------------------------------------------------------------
# One-time weight preparation (hoisted out of the per-call path)
# ---------------------------------------------------------------------------

def prepare_linear(weight, bias=None, compute_dtype=jnp.float32):
    """Relayout the (N, K) weight once: cast -> transpose to (K, N) -> pad to
    the tile grid.  Bias is kept in f32 (added once in the K epilogue).
    Returns (w_t, bias_2d, meta); pass it to linear_forward(prepared=...)."""
    N, K = weight.shape
    in_itemsize = jnp.dtype(compute_dtype).itemsize
    _, tn_cap, tk_cap, _ = _tile_caps(in_itemsize)
    tn = _choose_tile(N, tn_cap, 128)
    tk = _choose_tile(K, tk_cap, 128)
    Np, Kp = _round_up(N, tn), _round_up(K, tk)

    w_t = weight.astype(compute_dtype).T                      # (K, N)
    if (Kp, Np) != (K, N):
        w_t = jnp.pad(w_t, ((0, Kp - K), (0, Np - N)))

    b2d = None
    if bias is not None:
        b2d = bias.astype(jnp.float32).reshape(1, N)
        if Np != N:
            b2d = jnp.pad(b2d, ((0, 0), (0, Np - N)))

    meta = dict(N=N, K=K, tn=tn, tk=tk)
    return w_t, b2d, meta


# ---------------------------------------------------------------------------
# Kernels
# ---------------------------------------------------------------------------

def _linear_kernel_single_k(x_ref, w_ref, *refs, has_bias):
    # Whole K in one tile: no accumulator scratch, direct lane-dense store.
    if has_bias:
        b_ref, o_ref = refs
    else:
        (o_ref,) = refs
        b_ref = None
    acc = jnp.dot(x_ref[...], w_ref[...], preferred_element_type=jnp.float32)
    if has_bias:
        acc = acc + b_ref[...]
    o_ref[...] = acc.astype(o_ref.dtype)


def _linear_kernel_multi_k(x_ref, w_ref, *refs, has_bias):
    # K-reduction axis is the last grid axis; f32 accumulator lives in VMEM.
    if has_bias:
        b_ref, o_ref, acc_ref = refs
    else:
        o_ref, acc_ref = refs
        b_ref = None
    k = pl.program_id(2)

    @pl.when(k == 0)
    def _():
        acc_ref[...] = jnp.zeros_like(acc_ref)

    acc_ref[...] += jnp.dot(x_ref[...], w_ref[...],
                            preferred_element_type=jnp.float32)

    @pl.when(k == pl.num_programs(2) - 1)
    def _():
        acc = acc_ref[...]
        if has_bias:
            acc = acc + b_ref[...]
        o_ref[...] = acc.astype(o_ref.dtype)


# ---------------------------------------------------------------------------
# Forward
# ---------------------------------------------------------------------------

def linear_forward(x, weight, bias=None, *, prepared=None, compute_dtype=None,
                   force_pallas=False):
    """y = x @ weight.T (+ bias).

    x: (..., K); weight: (N, K); bias: (N,) or None.
    prepared: output of prepare_linear(weight, bias, compute_dtype) — hoists
      the weight relayout out of the per-call path (recommended).
    compute_dtype: MXU input dtype (default: x.dtype, matching the module's
      `weight.to(x.dtype)`); bf16 accumulates in f32 inside the kernel.
    """
    *lead, K = x.shape
    N = weight.shape[0]
    assert weight.shape[1] == K, "weight must be (out_features, in_features)"
    x2d = x.reshape(-1, K)
    M = x2d.shape[0]

    # --- small-problem fallback: XLA's fused dot wins at tiny sizes ---------
    if not force_pallas and (max(M, N, K) < 256 or M * N * K < (1 << 21)):
        y = x2d @ weight.astype(x.dtype).T
        if bias is not None:
            y = y + bias.astype(y.dtype)
        return y.reshape(*lead, N)

    # --- resolve compute dtype / prepared weights ---------------------------
    if compute_dtype is None:
        compute_dtype = prepared[0].dtype if prepared is not None else x.dtype
    if prepared is None:
        prepared = prepare_linear(weight, bias, compute_dtype=compute_dtype)
    w_t, b2d, meta = prepared
    tn, tk = meta["tn"], meta["tk"]
    Kp, Np = w_t.shape
    has_bias = b2d is not None
    out_dtype = x.dtype
    in_bytes = jnp.dtype(compute_dtype).itemsize
    out_bytes = jnp.dtype(out_dtype).itemsize

    # --- M tile (depends on the activation only) ----------------------------
    tm_cap, _, _, vmem_cap = _tile_caps(in_bytes)
    tm = _choose_tile(M, tm_cap, 8)
    Mp = _round_up(M, tm)

    # --- pad x only when strictly needed ------------------------------------
    x2d = x2d.astype(compute_dtype)
    if (Mp, Kp) != (M, K):
        x2d = jnp.pad(x2d, ((0, Mp - M), (0, Kp - K)))

    kk = Kp // tk
    multi_k = kk > 1

    # --- VMEM footprint & explicit scoped-VMEM limit -------------------------
    footprint = (2 * (tm * tk + tk * tn) * in_bytes      # double-buffered inputs
                 + 2 * tm * tn * out_bytes               # double-buffered output
                 + (tm * tn * 4 if multi_k else 0)       # f32 accumulator
                 + (2 * tn * 4 if has_bias else 0))      # bias tiles
    vmem_limit = max(footprint + (4 << 20), 32 << 20)
    vmem_limit = int(min(vmem_limit, vmem_cap - (8 << 20)))

    cost = pl.CostEstimate(
        flops=2 * Mp * Np * Kp,
        transcendentals=0,
        bytes_accessed=int(Mp * Kp * in_bytes * (Np // tn)     # x re-read / N tile
                           + Kp * Np * in_bytes * (Mp // tm)   # W re-read / M tile
                           + Mp * Np * out_bytes
                           + (Np * 4 if has_bias else 0)))

    if multi_k:
        grid = (Mp // tm, Np // tn, kk)
        x_spec = pl.BlockSpec((tm, tk), lambda i, j, k: (i, k))
        w_spec = pl.BlockSpec((tk, tn), lambda i, j, k: (k, j))
        b_spec = pl.BlockSpec((1, tn), lambda i, j, k: (0, j))
        o_spec = pl.BlockSpec((tm, tn), lambda i, j, k: (i, j))
        kernel = functools.partial(_linear_kernel_multi_k, has_bias=has_bias)
        scratch = [pltpu.VMEM((tm, tn), jnp.float32)]
        dims = ("parallel", "parallel", "arbitrary")
    else:
        grid = (Mp // tm, Np // tn)
        x_spec = pl.BlockSpec((tm, tk), lambda i, j: (i, 0))
        w_spec = pl.BlockSpec((tk, tn), lambda i, j: (0, j))
        b_spec = pl.BlockSpec((1, tn), lambda i, j: (0, j))
        o_spec = pl.BlockSpec((tm, tn), lambda i, j: (i, j))
        kernel = functools.partial(_linear_kernel_single_k, has_bias=has_bias)
        scratch = []
        dims = ("parallel", "parallel")

    in_specs = [x_spec, w_spec] + ([b_spec] if has_bias else [])
    operands = (x2d, w_t) + ((b2d,) if has_bias else ())

    out = pl.pallas_call(
        kernel,
        out_shape=jax.ShapeDtypeStruct((Mp, Np), out_dtype),
        grid_spec=pltpu.PrefetchScalarGridSpec(
            num_scalar_prefetch=0,
            grid=grid,
            in_specs=in_specs,
            out_specs=o_spec,
            scratch_shapes=scratch,
        ),
        compiler_params=pltpu.CompilerParams(
            dimension_semantics=dims,
            vmem_limit_bytes=vmem_limit),
        cost_estimate=cost,
    )(*operands)

    if (Mp, Np) != (M, N):
        out = out[:M, :N]
    return out.reshape(*lead, N)


# ---------------------------------------------------------------------------
# Parameter init (JAX port of the PyTorch weight_init)
# ---------------------------------------------------------------------------

def weight_init(key, shape, mode, fan_in, fan_out):
    if mode == 'xavier_uniform':
        return jnp.sqrt(6 / (fan_in + fan_out)) * (
            jax.random.uniform(key, shape) * 2 - 1)
    if mode == 'xavier_normal':
        return jnp.sqrt(2 / (fan_in + fan_out)) * jax.random.normal(key, shape)
    if mode == 'kaiming_uniform':
        return jnp.sqrt(3 / fan_in) * (jax.random.uniform(key, shape) * 2 - 1)
    if mode == 'kaiming_normal':
        return jnp.sqrt(1 / fan_in) * jax.random.normal(key, shape)
    raise ValueError(f'Invalid init mode "{mode}"')


def make_linear_params(key, in_features, out_features, bias=True,
                       init_mode='kaiming_normal', init_weight=1, init_bias=0):
    kw, kb = jax.random.split(key)
    weight = weight_init(kw, (out_features, in_features), init_mode,
                         in_features, out_features) * init_weight
    b = (weight_init(kb, (out_features,), init_mode,
                     in_features, out_features) * init_bias) if bias else None
    return weight, b


# ---------------------------------------------------------------------------
# Demo / self-test
# ---------------------------------------------------------------------------

if __name__ == "__main__":
    key = jax.random.PRNGKey(0)
    k_x, k_p, k_x2, k_p2, k_x3, k_p3 = jax.random.split(key, 6)
    HIGH = jax.lax.Precision.HIGHEST

    # 1) Module-sized tiny Linear (in=32, out=32, batch=8).
    batch, in_f, out_f = 8, 32, 32
    x = jax.random.normal(k_x, (batch, in_f), dtype=jnp.float32)
    w, b = make_linear_params(k_p, in_f, out_f, bias=True)
    y_ref = jnp.dot(x, w.T, precision=HIGH) + b
    y_auto = linear_forward(x, w, b)                      # small-shape fallback
    y_pal = linear_forward(x, w, b, force_pallas=True)    # Pallas kernel path
    jax.block_until_ready((y_auto, y_pal))
    assert y_pal.shape == (batch, out_f)
    assert jnp.allclose(y_auto, y_ref, atol=1e-5, rtol=1e-5)
    assert jnp.allclose(y_pal, y_ref, atol=1e-4, rtol=1e-4)

    # 2) Ragged leading dims + hoisted (prepared) weight; full-extent tiles,
    #    so no padding of x or W is needed.
    x2 = jax.random.normal(k_x2, (3, 17, 200), dtype=jnp.float32)
    w2, b2 = make_linear_params(k_p2, 200, 300, bias=True, init_bias=1.0)
    prep2 = prepare_linear(w2, b2, compute_dtype=jnp.float32)
    y2 = linear_forward(x2, w2, b2, prepared=prep2, force_pallas=True)
    jax.block_until_ready(y2)
    y2_ref = jnp.einsum('bsk,nk->bsn', x2, w2, precision=HIGH) + b2
    assert y2.shape == (3, 17, 300)
    assert jnp.allclose(y2, y2_ref, atol=1e-3, rtol=1e-3)

    # 3) K larger than the tile cap -> multi-step K grid with the resident
    #    f32 VMEM accumulator.
    x3 = jax.random.normal(k_x3, (64, 2304), dtype=jnp.float32)
    w3, b3 = make_linear_params(k_p3, 2304, 256, bias=True, init_bias=1.0)
    y3 = linear_forward(x3, w3, b3, force_pallas=True)
    jax.block_until_ready(y3)
    y3_ref = jnp.dot(x3, w3.T, precision=HIGH) + b3
    assert y3.shape == (64, 256)
    assert jnp.allclose(y3, y3_ref, atol=2e-3, rtol=2e-3)

    # 4) No-bias path.
    y4 = linear_forward(x, w, None, force_pallas=True)
    jax.block_until_ready(y4)
    assert jnp.allclose(y4, jnp.dot(x, w.T, precision=HIGH), atol=1e-4, rtol=1e-4)

    # 5) Optional bf16 MXU path (f32 accumulation), gated by tolerance.
    y5 = linear_forward(x3, w3, b3, compute_dtype=jnp.bfloat16, force_pallas=True)
    jax.block_until_ready(y5)
    assert jnp.allclose(y5, y3_ref, atol=0.1, rtol=0.1)

    print("KERNEL_OK")
</pallas_src>

<mosaic_0001>
module attributes {stable_mosaic.version = 11 : i64} {
  func.func @_linear_kernel_single_k(%arg0: i32, %arg1: i32, %arg2: memref<8x32xf32, #tpu.memory_space<vmem>>, %arg3: memref<32x32xf32, #tpu.memory_space<vmem>>, %arg4: memref<1x32xf32, #tpu.memory_space<vmem>>, %arg5: memref<8x32xf32, #tpu.memory_space<vmem>>) attributes {dimension_semantics = [#tpu.dimension_semantics<parallel>, #tpu.dimension_semantics<parallel>], iteration_bounds = array<i64: 1, 1>, scalar_prefetch = 0 : i64, scratch_operands = 0 : i64, tpu.core_type = #tpu.core_type<tc>, window_params = [{transform_indices = @transform_0, window_bounds = array<i64: 8, 32>}, {transform_indices = @transform_1, window_bounds = array<i64: 32, 32>}, {transform_indices = @transform_2, window_bounds = array<i64: 1, 32>}, {transform_indices = @transform_3, window_bounds = array<i64: 8, 32>}]} {
    %c0 = arith.constant 0 : index
    %c0_0 = arith.constant 0 : index
    %0 = vector.load %arg2[%c0, %c0_0] : memref<8x32xf32, #tpu.memory_space<vmem>>, vector<8x32xf32>
    %c0_1 = arith.constant 0 : index
    %c0_2 = arith.constant 0 : index
    %1 = vector.load %arg3[%c0_1, %c0_2] : memref<32x32xf32, #tpu.memory_space<vmem>>, vector<32x32xf32>
    %cst = arith.constant dense<0.000000e+00> : vector<8x32xf32>
    %2 = tpu.matmul %0, %1, %cst {dimension_numbers = #tpu.dot_dimension_numbers<[1], [0], [0], [1], [0, 0, 1, 1], [], []>} : vector<8x32xf32>, vector<32x32xf32>, vector<8x32xf32> -> vector<8x32xf32>
    %c0_3 = arith.constant 0 : index
    %c0_4 = arith.constant 0 : index
    %3 = vector.load %arg4[%c0_3, %c0_4] : memref<1x32xf32, #tpu.memory_space<vmem>>, vector<1x32xf32>
    %4 = vector.broadcast %3 : vector<1x32xf32> to vector<8x32xf32>
    %5 = arith.addf %2, %4 : vector<8x32xf32>
    %c0_5 = arith.constant 0 : index
    %c0_6 = arith.constant 0 : index
    %6 = vector.load %arg5[%c0_5, %c0_6] : memref<8x32xf32, #tpu.memory_space<vmem>>, vector<8x32xf32>
    tpu.vector_store %arg5[%c0_5, %c0_6], %5 {strides = array<i32>} : memref<8x32xf32, #tpu.memory_space<vmem>>, vector<8x32xf32>,
    return
  }
  func.func @transform_0(%arg0: i32, %arg1: i32) -> (i32, i32) {
    %c0_i32 = arith.constant 0 : i32
    %c0_i32_0 = arith.constant 0 : i32
    return %arg0, %c0_i32 : i32, i32
  }
  func.func @transform_1(%arg0: i32, %arg1: i32) -> (i32, i32) {
    %c0_i32 = arith.constant 0 : i32
    %c0_i32_0 = arith.constant 0 : i32
    return %c0_i32, %arg1 : i32, i32
  }
  func.func @transform_2(%arg0: i32, %arg1: i32) -> (i32, i32) {
    %c0_i32 = arith.constant 0 : i32
    %c0_i32_0 = arith.constant 0 : i32
    return %c0_i32, %arg1 : i32, i32
  }
  func.func @transform_3(%arg0: i32, %arg1: i32) -> (i32, i32) {
    %c0_i32 = arith.constant 0 : i32
    return %arg0, %arg1 : i32, i32
  }
}

</mosaic_0001>

<bundles_post_ra>
// kernel: tpu_custom_call.1
= control target key start
LH: loop header
LB: loop body
LE: loop exit
PB: predicated region body
PF: predicated region fallthrough
CT: control target
= control target key end

     0   :  { %8 = vsyncpa [#allocation3], 0  ;;  %s219_s0 = inlined_call_operand.hbm [shape: f32[8,32], index: 0, kind: input, shape index: {}]   ;;  %s220_s1 = inlined_call_operand.hbm [shape: f32[32,32], index: 1, kind: input, shape index: {}]   ;;  %s221_s2 = inlined_call_operand.vmem [shape: f32[1,32], index: 2, kind: input, shape index: {}]   ;;  %s222_s3 = inlined_call_operand.hbm [shape: f32[8,32], index: 3, kind: output, shape index: {}]  }
   0x1   :  { %9 = vsyncpa [#allocation6], 0 }
   0x2   :  { %10 = vsyncpa [#allocation4], 0  ;;  %s16_s14 = sshll.u32 %s219_s0, 4  ;;  %s182_s15 = smov [#allocation2]   ;;  %s17_s14 = int_to_ptr.hbm [resolvable:$true] %s16_s14 }
   0x3   :  { %s18_s16 = sshll.u32 %s182_s15, 4  ;;  %s26_s19 = sshll.u32 %s220_s1, 4  ;;  %s19_s16 = int_to_ptr.vmem [resolvable:$true] %s18_s16  ;;  %s27_s19 = int_to_ptr.hbm [resolvable:$true] %s26_s19 }
   0x4   :  { %21 = dma.hbm_to_vmem [thread:$0]  %s17_s14, 128, %s19_s16, [#allocation3]  }
   0x5   :  { %s183_s20 = smov [#allocation5]   ;;  %s184_s22 = smov 128  }
   0x6   :  { %s28_s21 = sshll.u32 %s183_s20, 4  ;;  %s185_s23 = smov 8   ;;  %s29_s21 = int_to_ptr.vmem [resolvable:$true] %s28_s21 }
   0x7   :  { %34 = dma.hbm_to_vmem [thread:$0]  %s27_s19, 512, %s29_s21, [#allocation6], %s184_s22, %s184_s22, %s185_s23  }
   0x8   :  { %176 = dma.done.wait [#allocation3], 128  }
   0x9   :  { %177 = vsyncadd [#allocation3], 4294967168 }
   0xa   :  { %178 = dma.done.wait [#allocation6], 512  }
   0xb   :  { %179 = vsyncadd [#allocation6], 4294966784  ;;  %v49_v0 = vld [vmem:[#allocation5 + $0x18] sm:$0xff]  ;;  %v48_v1 = vld [vmem:[#allocation5 + $0x10] sm:$0xff]  ;;  %vm54_vm0 = vcmask 261120   ;;  %s186_s24 = smov [#allocation7]  }
   0xc   :  { %70 = vmatpush.msra.mxu0 %v49_v0  ;;  %v47_v2 = vld [vmem:[#allocation5 + $0x8] sm:$0xff]  ;;  %v46_v3 = vld [vmem:[#allocation5] sm:$0xff]  ;;  %v45_v4 = vld [vmem:[#allocation2] sm:$0xff]  ;;  %s84_s25 = sshll.u32 %s186_s24, 4  ;;  %s86_s28 = sshll.u32 %s222_s3, 4  ;;  %s85_s25 = int_to_ptr.vmem [resolvable:$true] %s84_s25  ;;  %s87_s28 = int_to_ptr.hbm [resolvable:$true] %s86_s28 }
   0xd   :  { %v103_v5 = vld [vmem:[%s221_s2] ss:$0 sm:$0xff] }
   0xe   :  { %71 = vmatpush.msra.mxu0 %v48_v1 }
  0x10   :  { %72 = vmatpush.msra.mxu0 %v47_v2 }
  0x12   :  { %73 = vmatpush.msra.mxu0 %v46_v3 }
  0x13   :  { %97 = vmatmul.msk.f32.vlgmr.msra.gmra.mxu0 %vm54_vm0, %v45_v4 }
  0x90   :  { %v75_v6 = vpop.f32.mrf.mxu0 }
  0x91   :  { %v76_v7 = vadd.f32 %v103_v5, %v75_v6 }
  0x93   :  { %78 = vst.msk [vmem:[#allocation7] sm:$0xff] %vm54_vm0, %v76_v7 }
  0x94   :  { %89 = dma.vmem_to_hbm [thread:$0]  %s85_s25, 128, %s87_s28, [#allocation4]  }
  0x95   :  { %180 = dma.done.wait [#allocation4], 128  }
  0x96   :  { %181 = vsyncadd [#allocation4], 4294967168 }
  0x97   :  { %94 = vsyncpa [#allocation3], 1 }
  0x98   :  { %95 = vsyncpa [#allocation6], 1 }
  0x99   :  { %96 = vsyncpa [#allocation4], 1 }

</bundles_post_ra>
